<compile_context>
chip_gen: v7x
topology: tpu7x:2x2x1
jax: 0.10.0
libtpu: 0.0.40
codegen_flags: <defaults>
</compile_context>

<pallas_src>
import functools

import jax
import jax.numpy as jnp
from jax.experimental import pallas as pl
from jax.experimental.pallas import tpu as pltpu


def _round_up(x, m):
    return ((x + m - 1) // m) * m


def _pad_to(a, shape):
    pads = [(0, t - s) for s, t in zip(a.shape, shape)]
    if any(p[1] for p in pads):
        return jnp.pad(a, pads)
    return a


def _fcnn_kernel(x_ref, w1_ref, b1_ref, w2_ref, b2_ref, w3_ref, b3_ref, o_ref):
    """Fused MLP tile: relu(x@W1+b1) -> relu(.@W2+b2) -> .@W3+b3.

    Matmul operand dtype follows the (pre-cast) weight dtype; accumulation and
    all elementwise math are f32.  .astype() to the same dtype is a no-op, so
    the f32 path pays nothing for the casts below.
    """
    cdt = w1_ref.dtype  # bf16 on the fast path, f32 on the reference path

    x = x_ref[...].astype(cdt)

    h1 = jnp.dot(x, w1_ref[...], preferred_element_type=jnp.float32) + b1_ref[...]
    h1 = jnp.maximum(h1, 0.0)
    # dr1: identity in eval mode

    h2 = jnp.dot(h1.astype(cdt), w2_ref[...],
                 preferred_element_type=jnp.float32) + b2_ref[...]
    h2 = jnp.maximum(h2, 0.0)
    # dr2: identity in eval mode

    out = jnp.dot(h2.astype(cdt), w3_ref[...],
                  preferred_element_type=jnp.float32) + b3_ref[...]
    o_ref[...] = out.astype(o_ref.dtype)


@functools.partial(jax.jit, static_argnames=("tb", "use_bf16"))
def fcnn_forward(x, params, *, tb=4096, use_bf16=True):
    """x: (B, n_feature) float32.  params: dict with w1,b1,w2,b2,w3,b3 stored as
    (in_features, out_features) / (1, out_features) float32."""
    B, F = x.shape
    H_real = params["w1"].shape[1]
    N_real = params["w3"].shape[1]

    # Hidden dim lane-dense (150 -> 256); output padded only to the sublane
    # granule (4 -> 8) to avoid writing a 128-wide slab of zeros per row.
    H = _round_up(H_real, 128)
    N = _round_up(N_real, 8)

    # Zero-pad weights/biases; padded rows/cols contribute exactly zero, so the
    # real output columns are bit-identical (in the f32 path).
    w1 = _pad_to(params["w1"], (F, H))
    b1 = _pad_to(params["b1"], (1, H))
    w2 = _pad_to(params["w2"], (H, H))
    b2 = _pad_to(params["b2"], (1, H))
    w3 = _pad_to(params["w3"], (H, N))
    b3 = _pad_to(params["b3"], (1, N))

    if use_bf16:
        # One-time cast in the wrapper: weights are VMEM-resident across the
        # whole grid, so casting here avoids per-step VPU converts and halves
        # the weight VMEM footprint / weight DMA.  Biases stay f32.
        w1 = w1.astype(jnp.bfloat16)
        w2 = w2.astype(jnp.bfloat16)
        w3 = w3.astype(jnp.bfloat16)

    # ---- Batch tiling -------------------------------------------------------
    # 8-aligned tile; batch padded up to a tile multiple.  Cap the tile so the
    # grid has >=2 steps (v7x megacore) and >=4 steps when the batch is large
    # enough that each step still gets a healthy (>=512-row) tile.
    tb_eff = min(tb, _round_up(B, 8))
    if B >= 4 * 512:
        tb_eff = min(tb_eff, _round_up(pl.cdiv(B, 4), 8))
    elif B > 8:
        tb_eff = min(tb_eff, _round_up(pl.cdiv(B, 2), 8))
    tb_eff = max(8, _round_up(tb_eff, 8))

    B_pad = _round_up(B, tb_eff)
    x_pad = _pad_to(x, (B_pad, F))
    grid = (B_pad // tb_eff,)

    # ---- VMEM budget (re-derived per tile; capped below v7x's 64 MiB) -------
    w_bpe = 2 if use_bf16 else 4
    vmem_est = (
        2 * tb_eff * F * 4                      # double-buffered x tiles (f32)
        + 2 * tb_eff * N * 4                    # double-buffered out tiles (f32)
        + (F * H + H * H + H * N) * w_bpe       # VMEM-resident weights
        + (2 * H + N) * 4                       # biases
        + 2 * tb_eff * H * 4                    # h1 / h2 f32 intermediates
        + 2 * tb_eff * H * w_bpe                # bf16 copies feeding the MXU
    )
    vmem_limit = int(min(56 << 20, max(32 << 20, int(1.5 * vmem_est) + (4 << 20))))

    # ---- Cost estimate (honest, post-padding-fix sizes) ----------------------
    flops = 2 * B_pad * (F * H + H * H + H * N)
    bytes_accessed = (
        4 * B_pad * F                           # x read
        + 4 * B_pad * N                         # out write
        + w_bpe * (F * H + H * H + H * N)       # weights
        + 4 * (2 * H + N)                       # biases
    )
    cost = pl.CostEstimate(
        flops=flops, transcendentals=0, bytes_accessed=bytes_accessed
    )

    out_padded = pl.pallas_call(
        _fcnn_kernel,
        out_shape=jax.ShapeDtypeStruct((B_pad, N), jnp.float32),
        grid=grid,
        in_specs=[
            # x tile walks the batch axis; feature axis is full-extent.
            pl.BlockSpec((tb_eff, F), lambda i: (i, 0)),
            # Weights / biases: constant index_map -> VMEM-resident across steps.
            pl.BlockSpec((F, H), lambda i: (0, 0)),
            pl.BlockSpec((1, H), lambda i: (0, 0)),
            pl.BlockSpec((H, H), lambda i: (0, 0)),
            pl.BlockSpec((1, H), lambda i: (0, 0)),
            pl.BlockSpec((H, N), lambda i: (0, 0)),
            pl.BlockSpec((1, N), lambda i: (0, 0)),
        ],
        out_specs=pl.BlockSpec((tb_eff, N), lambda i: (i, 0)),
        compiler_params=pltpu.CompilerParams(
            dimension_semantics=("parallel",),   # megacore sharding on v7x
            vmem_limit_bytes=vmem_limit,
        ),
        cost_estimate=cost,
    )(x_pad, w1, b1, w2, b2, w3, b3)

    # Slice away batch padding and the padded output columns.
    return out_padded[:B, :N_real]


def init_params(key, n_feature, h=150, n_out=4):
    """Deterministic init mimicking PyTorch nn.Linear (uniform +-1/sqrt(fan_in)).
    Weights stored as (in_features, out_features) (transpose of nn.Linear)."""
    ks = jax.random.split(key, 6)

    def lin(kw, kb, fan_in, fan_out):
        bound = 1.0 / jnp.sqrt(jnp.float32(fan_in))
        w = jax.random.uniform(kw, (fan_in, fan_out), jnp.float32, -bound, bound)
        b = jax.random.uniform(kb, (1, fan_out), jnp.float32, -bound, bound)
        return w, b

    w1, b1 = lin(ks[0], ks[1], n_feature, h)
    w2, b2 = lin(ks[2], ks[3], h, h)
    w3, b3 = lin(ks[4], ks[5], h, n_out)
    return {"w1": w1, "b1": b1, "w2": w2, "b2": b2, "w3": w3, "b3": b3}


def fcnn_reference(x, p):
    h1 = jnp.maximum(x @ p["w1"] + p["b1"], 0.0)
    h2 = jnp.maximum(h1 @ p["w2"] + p["b2"], 0.0)
    return h2 @ p["w3"] + p["b3"]


if __name__ == "__main__":
    key = jax.random.PRNGKey(0)
    k_x, k_p = jax.random.split(key)

    batch, n_feature = 8, 32
    x = jax.random.normal(k_x, (batch, n_feature), jnp.float32)
    params = init_params(k_p, n_feature)
    ref = fcnn_reference(x, params)

    # Strict reference check on the f32 path (bit-exact padding).
    out_f32 = jax.block_until_ready(fcnn_forward(x, params, use_bf16=False))
    assert out_f32.shape == (batch, 4), out_f32.shape
    assert jnp.allclose(out_f32, ref, atol=1e-4, rtol=1e-4), "f32 mismatch vs reference"

    # Production bf16 path (default): relaxed tolerance for bf16 operand rounding.
    out_bf16 = jax.block_until_ready(fcnn_forward(x, params))
    assert out_bf16.shape == (batch, 4), out_bf16.shape
    assert jnp.allclose(out_bf16, ref, atol=5e-2, rtol=5e-2), "bf16 mismatch vs reference"

    # Multi-tile, non-multiple batch: exercises grid/padding and the >=2-step split.
    x_big = jax.random.normal(k_x, (1000, n_feature), jnp.float32)
    ref_big = fcnn_reference(x_big, params)
    out_big = jax.block_until_ready(fcnn_forward(x_big, params, tb=256, use_bf16=False))
    assert out_big.shape == (1000, 4), out_big.shape
    assert jnp.allclose(out_big, ref_big, atol=1e-4, rtol=1e-4), "mismatch (tiled f32)"
    out_big_bf16 = jax.block_until_ready(fcnn_forward(x_big, params))
    assert jnp.allclose(out_big_bf16, ref_big, atol=5e-2, rtol=5e-2), "mismatch (tiled bf16)"

    print("KERNEL_OK")
</pallas_src>

<mosaic_0001>
module attributes {stable_mosaic.version = 11 : i64} {
  func.func @_fcnn_kernel(%arg0: i32, %arg1: memref<8x32xf32, #tpu.memory_space<vmem>>, %arg2: memref<32x256xf32, #tpu.memory_space<vmem>>, %arg3: memref<1x256xf32, #tpu.memory_space<vmem>>, %arg4: memref<256x256xf32, #tpu.memory_space<vmem>>, %arg5: memref<1x256xf32, #tpu.memory_space<vmem>>, %arg6: memref<256x8xf32, #tpu.memory_space<vmem>>, %arg7: memref<1x8xf32, #tpu.memory_space<vmem>>, %arg8: memref<8x8xf32, #tpu.memory_space<vmem>>) attributes {dimension_semantics = [#tpu.dimension_semantics<parallel>], iteration_bounds = array<i64: 1>, scalar_prefetch = 0 : i64, scratch_operands = 0 : i64, tpu.core_type = #tpu.core_type<tc>, window_params = [{transform_indices = @transform_0, window_bounds = array<i64: 8, 32>}, {pipeline_mode = #tpu.pipeline_mode<synchronous>, transform_indices = @transform_1, window_bounds = array<i64: 32, 256>}, {pipeline_mode = #tpu.pipeline_mode<synchronous>, transform_indices = @transform_2, window_bounds = array<i64: 1, 256>}, {pipeline_mode = #tpu.pipeline_mode<synchronous>, transform_indices = @transform_3, window_bounds = array<i64: 256, 256>}, {pipeline_mode = #tpu.pipeline_mode<synchronous>, transform_indices = @transform_4, window_bounds = array<i64: 1, 256>}, {pipeline_mode = #tpu.pipeline_mode<synchronous>, transform_indices = @transform_5, window_bounds = array<i64: 256, 8>}, {pipeline_mode = #tpu.pipeline_mode<synchronous>, transform_indices = @transform_6, window_bounds = array<i64: 1, 8>}, {transform_indices = @transform_7, window_bounds = array<i64: 8, 8>}]} {
    %c0 = arith.constant 0 : index
    %c0_0 = arith.constant 0 : index
    %0 = vector.load %arg1[%c0, %c0_0] : memref<8x32xf32, #tpu.memory_space<vmem>>, vector<8x32xf32>
    %c0_1 = arith.constant 0 : index
    %c0_2 = arith.constant 0 : index
    %1 = vector.load %arg2[%c0_1, %c0_2] : memref<32x256xf32, #tpu.memory_space<vmem>>, vector<32x256xf32>
    %cst = arith.constant dense<0.000000e+00> : vector<8x256xf32>
    %2 = tpu.matmul %0, %1, %cst {dimension_numbers = #tpu.dot_dimension_numbers<[1], [0], [0], [1], [0, 0, 1, 1], [], []>} : vector<8x32xf32>, vector<32x256xf32>, vector<8x256xf32> -> vector<8x256xf32>
    %c0_3 = arith.constant 0 : index
    %c0_4 = arith.constant 0 : index
    %3 = vector.load %arg3[%c0_3, %c0_4] : memref<1x256xf32, #tpu.memory_space<vmem>>, vector<1x256xf32>
    %4 = vector.broadcast %3 : vector<1x256xf32> to vector<8x256xf32>
    %5 = arith.addf %2, %4 : vector<8x256xf32>
    %cst_5 = arith.constant 0.000000e+00 : f32
    %6 = vector.broadcast %cst_5 : f32 to vector<8x256xf32>
    %7 = arith.maximumf %5, %6 : vector<8x256xf32>
    %c0_6 = arith.constant 0 : index
    %c0_7 = arith.constant 0 : index
    %8 = vector.load %arg4[%c0_6, %c0_7] : memref<256x256xf32, #tpu.memory_space<vmem>>, vector<256x256xf32>
    %cst_8 = arith.constant dense<0.000000e+00> : vector<8x256xf32>
    %9 = tpu.matmul %7, %8, %cst_8 {dimension_numbers = #tpu.dot_dimension_numbers<[1], [0], [0], [1], [0, 0, 1, 1], [], []>} : vector<8x256xf32>, vector<256x256xf32>, vector<8x256xf32> -> vector<8x256xf32>
    %c0_9 = arith.constant 0 : index
    %c0_10 = arith.constant 0 : index
    %10 = vector.load %arg5[%c0_9, %c0_10] : memref<1x256xf32, #tpu.memory_space<vmem>>, vector<1x256xf32>
    %11 = vector.broadcast %10 : vector<1x256xf32> to vector<8x256xf32>
    %12 = arith.addf %9, %11 : vector<8x256xf32>
    %cst_11 = arith.constant 0.000000e+00 : f32
    %13 = vector.broadcast %cst_11 : f32 to vector<8x256xf32>
    %14 = arith.maximumf %12, %13 : vector<8x256xf32>
    %c0_12 = arith.constant 0 : index
    %c0_13 = arith.constant 0 : index
    %15 = vector.load %arg6[%c0_12, %c0_13] : memref<256x8xf32, #tpu.memory_space<vmem>>, vector<256x8xf32>
    %cst_14 = arith.constant dense<0.000000e+00> : vector<8x8xf32>
    %16 = tpu.matmul %14, %15, %cst_14 {dimension_numbers = #tpu.dot_dimension_numbers<[1], [0], [0], [1], [0, 0, 1, 1], [], []>} : vector<8x256xf32>, vector<256x8xf32>, vector<8x8xf32> -> vector<8x8xf32>
    %c0_15 = arith.constant 0 : index
    %c0_16 = arith.constant 0 : index
    %17 = vector.load %arg7[%c0_15, %c0_16] : memref<1x8xf32, #tpu.memory_space<vmem>>, vector<1x8xf32>
    %18 = vector.broadcast %17 : vector<1x8xf32> to vector<8x8xf32>
    %19 = arith.addf %16, %18 : vector<8x8xf32>
    %c0_17 = arith.constant 0 : index
    %c0_18 = arith.constant 0 : index
    %20 = vector.load %arg8[%c0_17, %c0_18] : memref<8x8xf32, #tpu.memory_space<vmem>>, vector<8x8xf32>
    tpu.vector_store %arg8[%c0_17, %c0_18], %19 {strides = array<i32>} : memref<8x8xf32, #tpu.memory_space<vmem>>, vector<8x8xf32>,
    return
  }
  func.func @transform_0(%arg0: i32) -> (i32, i32) {
    %c0_i32 = arith.constant 0 : i32
    %c0_i32_0 = arith.constant 0 : i32
    return %arg0, %c0_i32 : i32, i32
  }
  func.func @transform_1(%arg0: i32) -> (i32, i32) {
    %c0_i32 = arith.constant 0 : i32
    %c0_i32_0 = arith.constant 0 : i32
    %c0_i32_1 = arith.constant 0 : i32
    return %c0_i32, %c0_i32_0 : i32, i32
  }
  func.func @transform_2(%arg0: i32) -> (i32, i32) {
    %c0_i32 = arith.constant 0 : i32
    %c0_i32_0 = arith.constant 0 : i32
    %c0_i32_1 = arith.constant 0 : i32
    return %c0_i32, %c0_i32_0 : i32, i32
  }
  func.func @transform_3(%arg0: i32) -> (i32, i32) {
    %c0_i32 = arith.constant 0 : i32
    %c0_i32_0 = arith.constant 0 : i32
    %c0_i32_1 = arith.constant 0 : i32
    return %c0_i32, %c0_i32_0 : i32, i32
  }
  func.func @transform_4(%arg0: i32) -> (i32, i32) {
    %c0_i32 = arith.constant 0 : i32
    %c0_i32_0 = arith.constant 0 : i32
    %c0_i32_1 = arith.constant 0 : i32
    return %c0_i32, %c0_i32_0 : i32, i32
  }
  func.func @transform_5(%arg0: i32) -> (i32, i32) {
    %c0_i32 = arith.constant 0 : i32
    %c0_i32_0 = arith.constant 0 : i32
    %c0_i32_1 = arith.constant 0 : i32
    return %c0_i32, %c0_i32_0 : i32, i32
  }
  func.func @transform_6(%arg0: i32) -> (i32, i32) {
    %c0_i32 = arith.constant 0 : i32
    %c0_i32_0 = arith.constant 0 : i32
    %c0_i32_1 = arith.constant 0 : i32
    return %c0_i32, %c0_i32_0 : i32, i32
  }
  func.func @transform_7(%arg0: i32) -> (i32, i32) {
    %c0_i32 = arith.constant 0 : i32
    %c0_i32_0 = arith.constant 0 : i32
    return %arg0, %c0_i32 : i32, i32
  }
}

</mosaic_0001>

<bundles_post_ra>
// kernel: fcnn_forward.1
= control target key start
LH: loop header
LB: loop body
LE: loop exit
PB: predicated region body
PF: predicated region fallthrough
CT: control target
= control target key end

     0   :  { %v530_v3 = vmov 0.0   ;;  %vm47_vm0 = vcmask 261120   ;;  %vm382_vm1 = vcmask 64512   ;;  %s898_s1 = inlined_call_operand.vmem [shape: f32[32,256], index: 1, kind: input, shape index: {}]   ;;  %s899_s3 = inlined_call_operand.vmem [shape: f32[256,256], index: 3, kind: input, shape index: {}]   ;;  %s900_s0 = inlined_call_operand.vmem [shape: f32[8,32], index: 0, kind: input, shape index: {}]   ;;  %s901_s5 = inlined_call_operand.vmem [shape: f32[256,8], index: 5, kind: input, shape index: {}]   ;;  %s902_s2 = inlined_call_operand.vmem [shape: f32[1,256], index: 2, kind: input, shape index: {}]   ;;  %s903_s4 = inlined_call_operand.vmem [shape: f32[1,256], index: 4, kind: input, shape index: {}]   ;;  %s904_s6 = inlined_call_operand.vmem [shape: f32[1,8], index: 6, kind: input, shape index: {}]   ;;  %s905_s7 = inlined_call_operand.vmem [shape: f32[8,8], index: 7, kind: output, shape index: {}]  }
   0x1   :  { %v28_v0 = vld [vmem:[%s898_s1 + $0x8] sm:$0xff]  ;;  %v30_v1 = vld [vmem:[%s898_s1 + $0x18] sm:$0xff]  ;;  %v27_v2 = vld [vmem:[%s898_s1] sm:$0xff]  ;;  %115 = vmatprep.mubr.f32.mxu0 %v530_v3 }
   0x2   :  { %v425_v4 = vpack.c.bf16 %v30_v1, %v28_v0  ;;  %v29_v5 = vld [vmem:[%s898_s1 + $0x10] sm:$0xff]  ;;  %v32_v6 = vld [vmem:[%s898_s1 + $0x28] sm:$0xff]  ;;  %v34_v7 = vld [vmem:[%s898_s1 + $0x38] sm:$0xff] }
   0x3   :  { %v427_v8 = vpack.c.bf16 %v29_v5, %v27_v2  ;;  %v429_v9 = vpack.c.bf16 %v34_v7, %v32_v6  ;;  %v31_v10 = vld [vmem:[%s898_s1 + $0x20] sm:$0xff]  ;;  %v33_v11 = vld [vmem:[%s898_s1 + $0x30] sm:$0xff]  ;;  %v125_v12 = vld [vmem:[%s899_s3 + $0x8] sm:$0xff] }
   0x4   :  { %426 = vmatprep.subr.bf16.mxu0 %v425_v4  ;;  %v127_v13 = vld [vmem:[%s899_s3 + $0x18] sm:$0xff]  ;;  %v124_v14 = vld [vmem:[%s899_s3] sm:$0xff]  ;;  %v431_v15 = vpack.c.bf16 %v33_v11, %v31_v10  ;;  %v126_v17 = vld [vmem:[%s899_s3 + $0x10] sm:$0xff] }
   0x5   :  { %428 = vmatpush1.bf16.msra.mxu0 %v427_v8  ;;  %v433_v16 = vpack.c.bf16 %v127_v13, %v125_v12  ;;  %v129_v18 = vld [vmem:[%s899_s3 + $0x28] sm:$0xff]  ;;  %v131_v19 = vld [vmem:[%s899_s3 + $0x38] sm:$0xff]  ;;  %v435_v20 = vpack.c.bf16 %v126_v17, %v124_v14  ;;  %v128_v22 = vld [vmem:[%s899_s3 + $0x20] sm:$0xff] }
   0x6   :  { %430 = vmatprep.subr.bf16.mxu0 %v429_v9  ;;  %v437_v21 = vpack.c.bf16 %v131_v19, %v129_v18  ;;  %v130_v23 = vld [vmem:[%s899_s3 + $0x30] sm:$0xff]  ;;  %v133_v24 = vld [vmem:[%s899_s3 + $0x48] sm:$0xff]  ;;  %v135_v25 = vld [vmem:[%s899_s3 + $0x58] sm:$0xff] }
   0x7   :  { %434 = vmatprep.subr.bf16.mxu1 %v433_v16  ;;  %v439_v26 = vpack.c.bf16 %v130_v23, %v128_v22  ;;  %v26_v27 = vld [vmem:[%s900_s0] sm:$0xff]  ;;  %v441_v28 = vpack.c.bf16 %v135_v25, %v133_v24  ;;  %v134_v30 = vld [vmem:[%s899_s3 + $0x50] sm:$0xff]  ;;  %v137_v31 = vld [vmem:[%s899_s3 + $0x68] sm:$0xff] }
   0x8   :  { %436 = vmatpush1.bf16.msra.mxu1 %v435_v20  ;;  %v132_v29 = vld [vmem:[%s899_s3 + $0x40] sm:$0xff]  ;;  %v139_v32 = vld [vmem:[%s899_s3 + $0x78] sm:$0xff]  ;;  %v138_v36 = vld [vmem:[%s899_s3 + $0x70] sm:$0xff] }
   0x9   :  { %432 = vmatpush1.bf16.msra.mxu0 %v431_v15  ;;  %438 = vmatprep.subr.bf16.mxu1 %v437_v21  ;;  %v443_v33 = vpack.c.bf16 %v134_v30, %v132_v29  ;;  %v445_v34 = vpack.c.bf16 %v139_v32, %v137_v31  ;;  %v136_v35 = vld [vmem:[%s899_s3 + $0x60] sm:$0xff]  ;;  %v141_v37 = vld [vmem:[%s899_s3 + $0x88] sm:$0xff]  ;;  %v143_v38 = vld [vmem:[%s899_s3 + $0x98] sm:$0xff] }
   0xa   :  { %v447_v39 = vpack.c.bf16 %v138_v36, %v136_v35  ;;  %v449_v40 = vpack.c.bf16 %v143_v38, %v141_v37  ;;  %v140_v41 = vld [vmem:[%s899_s3 + $0x80] sm:$0xff]  ;;  %v142_v42 = vld [vmem:[%s899_s3 + $0x90] sm:$0xff]  ;;  %v145_v43 = vld [vmem:[%s899_s3 + $0xa8] sm:$0xff] }
   0xb   :  { %v147_v44 = vld [vmem:[%s899_s3 + $0xb8] sm:$0xff]  ;;  %v451_v45 = vpack.c.bf16 %v142_v42, %v140_v41  ;;  %v144_v47 = vld [vmem:[%s899_s3 + $0xa0] sm:$0xff]  ;;  %v146_v48 = vld [vmem:[%s899_s3 + $0xb0] sm:$0xff] }
   0xc   :  { %388 = vmatmul.mubr.msk.f32.vlgmr.msra.gmra.mrb[0].mxu0 %vm47_vm0, %v26_v27  ;;  %440 = vmatpush1.bf16.msra.mxu1 %v439_v26  ;;  %v453_v46 = vpack.c.bf16 %v147_v44, %v145_v43  ;;  %v149_v49 = vld [vmem:[%s899_s3 + $0xc8] sm:$0xff]  ;;  %v151_v50 = vld [vmem:[%s899_s3 + $0xd8] sm:$0xff]  ;;  %v455_v51 = vpack.c.bf16 %v146_v48, %v144_v47  ;;  %v148_v53 = vld [vmem:[%s899_s3 + $0xc0] sm:$0xff] }
   0xd   :  { %442 = vmatprep.subr.bf16.mxu1 %v441_v28  ;;  %v457_v52 = vpack.c.bf16 %v151_v50, %v149_v49  ;;  %v150_v54 = vld [vmem:[%s899_s3 + $0xd0] sm:$0xff]  ;;  %v153_v55 = vld [vmem:[%s899_s3 + $0xe8] sm:$0xff]  ;;  %v155_v56 = vld [vmem:[%s899_s3 + $0xf8] sm:$0xff] }
   0xe   :  { %v459_v57 = vpack.c.bf16 %v150_v54, %v148_v53  ;;  %v461_v58 = vpack.c.bf16 %v155_v56, %v153_v55  ;;  %v152_v59 = vld [vmem:[%s899_s3 + $0xe0] sm:$0xff]  ;;  %v154_v60 = vld [vmem:[%s899_s3 + $0xf0] sm:$0xff]  ;;  %v157_v61 = vld [vmem:[%s899_s3 + $0x108] sm:$0xff] }
   0xf   :  { %v159_v62 = vld [vmem:[%s899_s3 + $0x118] sm:$0xff]  ;;  %v463_v63 = vpack.c.bf16 %v154_v60, %v152_v59  ;;  %v156_v1 = vld [vmem:[%s899_s3 + $0x100] sm:$0xff]  ;;  %v158_v2 = vld [vmem:[%s899_s3 + $0x110] sm:$0xff] }
  0x10   :  { %444 = vmatpush1.bf16.msra.mxu1 %v443_v33  ;;  %v465_v0 = vpack.c.bf16 %v159_v62, %v157_v61  ;;  %v161_v3 = vld [vmem:[%s899_s3 + $0x128] sm:$0xff]  ;;  %v163_v4 = vld [vmem:[%s899_s3 + $0x138] sm:$0xff]  ;;  %v467_v5 = vpack.c.bf16 %v158_v2, %v156_v1  ;;  %v160_v7 = vld [vmem:[%s899_s3 + $0x120] sm:$0xff] }
  0x11   :  { %446 = vmatprep.subr.bf16.mxu1 %v445_v34  ;;  %v469_v6 = vpack.c.bf16 %v163_v4, %v161_v3  ;;  %v162_v8 = vld [vmem:[%s899_s3 + $0x130] sm:$0xff]  ;;  %v165_v9 = vld [vmem:[%s899_s3 + $0x148] sm:$0xff]  ;;  %v167_v10 = vld [vmem:[%s899_s3 + $0x158] sm:$0xff] }
  0x12   :  { %v471_v11 = vpack.c.bf16 %v162_v8, %v160_v7  ;;  %v473_v12 = vpack.c.bf16 %v167_v10, %v165_v9  ;;  %v164_v13 = vld [vmem:[%s899_s3 + $0x140] sm:$0xff]  ;;  %v166_v14 = vld [vmem:[%s899_s3 + $0x150] sm:$0xff]  ;;  %v169_v15 = vld [vmem:[%s899_s3 + $0x168] sm:$0xff] }
  0x13   :  { %v171_v16 = vld [vmem:[%s899_s3 + $0x178] sm:$0xff]  ;;  %v475_v17 = vpack.c.bf16 %v166_v14, %v164_v13  ;;  %v168_v19 = vld [vmem:[%s899_s3 + $0x160] sm:$0xff]  ;;  %v170_v20 = vld [vmem:[%s899_s3 + $0x170] sm:$0xff] }
  0x14   :  { %448 = vmatpush1.bf16.msra.mxu1 %v447_v39  ;;  %v477_v18 = vpack.c.bf16 %v171_v16, %v169_v15  ;;  %v173_v21 = vld [vmem:[%s899_s3 + $0x188] sm:$0xff]  ;;  %v175_v22 = vld [vmem:[%s899_s3 + $0x198] sm:$0xff]  ;;  %v479_v23 = vpack.c.bf16 %v170_v20, %v168_v19  ;;  %v172_v25 = vld [vmem:[%s899_s3 + $0x180] sm:$0xff] }
  0x15   :  { %450 = vmatprep.subr.bf16.mxu1 %v449_v40  ;;  %v481_v24 = vpack.c.bf16 %v175_v22, %v173_v21  ;;  %v174_v26 = vld [vmem:[%s899_s3 + $0x190] sm:$0xff]  ;;  %v177_v27 = vld [vmem:[%s899_s3 + $0x1a8] sm:$0xff]  ;;  %v179_v28 = vld [vmem:[%s899_s3 + $0x1b8] sm:$0xff]  ;;  %v37_v21 = vlaneseq }
  0x16   :  { %v483_v29 = vpack.c.bf16 %v174_v26, %v172_v25  ;;  %v485_v30 = vpack.c.bf16 %v179_v28, %v177_v27  ;;  %v176_v31 = vld [vmem:[%s899_s3 + $0x1a0] sm:$0xff]  ;;  %v178_v32 = vld [vmem:[%s899_s3 + $0x1b0] sm:$0xff]  ;;  %v181_v33 = vld [vmem:[%s899_s3 + $0x1c8] sm:$0xff] }
  0x17   :  { %v183_v34 = vld [vmem:[%s899_s3 + $0x1d8] sm:$0xff]  ;;  %v487_v35 = vpack.c.bf16 %v178_v32, %v176_v31  ;;  %v180_v37 = vld [vmem:[%s899_s3 + $0x1c0] sm:$0xff]  ;;  %v182_v38 = vld [vmem:[%s899_s3 + $0x1d0] sm:$0xff]  ;;  %v38_v22 = vshrl.u32 %v37_v21, 7 }
  0x18   :  { %452 = vmatpush1.bf16.msra.mxu1 %v451_v45  ;;  %v489_v36 = vpack.c.bf16 %v183_v34, %v181_v33  ;;  %v491_v39 = vpack.c.bf16 %v182_v38, %v180_v37  ;;  %v185_v40 = vld [vmem:[%s899_s3 + $0x1e8] sm:$0xff]  ;;  %v187_v41 = vld [vmem:[%s899_s3 + $0x1f8] sm:$0xff]  ;;  %v184_v43 = vld [vmem:[%s899_s3 + $0x1e0] sm:$0xff] }
  0x19   :  { %454 = vmatprep.subr.bf16.mxu1 %v453_v46  ;;  %v493_v42 = vpack.c.bf16 %v187_v41, %v185_v40  ;;  %v186_v44 = vld [vmem:[%s899_s3 + $0x1f0] sm:$0xff]  ;;  %v289_v46 = vld [vmem:[%s901_s5 + $0x80] sm:$0xff]  ;;  %v290_v47 = vld [vmem:[%s901_s5 + $0x88] sm:$0xff]  ;;  %v43_v25 = vsub.s32 1, %v38_v22 }
  0x1a   :  { %v495_v45 = vpack.c.bf16 %v186_v44, %v184_v43  ;;  %v273_v48 = vld [vmem:[%s901_s5] sm:$0xff]  ;;  %v497_v49 = vpack.c.bf16 %v290_v47, %v289_v46  ;;  %v274_v50 = vld [vmem:[%s901_s5 + $0x8] sm:$0xff]  ;;  %v275_v55 = vld [vmem:[%s901_s5 + $0x10] sm:$0xff] }
  0x1b   :  { %v499_v53 = vpack.c.bf16 %v274_v50, %v273_v48  ;;  %v276_v56 = vld [vmem:[%s901_s5 + $0x18] sm:$0xff]  ;;  %v277_v61 = vld [vmem:[%s901_s5 + $0x20] sm:$0xff]  ;;  %v278_v62 = vld [vmem:[%s901_s5 + $0x28] sm:$0xff] }
  0x1c   :  { %456 = vmatpush1.bf16.msra.mxu1 %v455_v51  ;;  %v291_v51 = vld [vmem:[%s901_s5 + $0x90] sm:$0xff]  ;;  %498 = vmatprep.subr.bf16.mxu0 %v497_v49  ;;  %v503_v59 = vpack.c.bf16 %v276_v56, %v275_v55  ;;  %v507_v1 = vpack.c.bf16 %v278_v62, %v277_v61  ;;  %v280_v4 = vld [vmem:[%s901_s5 + $0x38] sm:$0xff]  ;;  %v281_v9 = vld [vmem:[%s901_s5 + $0x40] sm:$0xff] }
  0x1d   :  { %458 = vmatprep.subr.bf16.mxu1 %v457_v52  ;;  %v292_v52 = vld [vmem:[%s901_s5 + $0x98] sm:$0xff]  ;;  %500 = vmatpush3.bf16.msra.mxu0 %v499_v53  ;;  %v279_v3 = vld [vmem:[%s901_s5 + $0x30] sm:$0xff]  ;;  %v282_v10 = vld [vmem:[%s901_s5 + $0x48] sm:$0xff] }
  0x1e   :  { %v501_v54 = vpack.c.bf16 %v292_v52, %v291_v51  ;;  %v511_v7 = vpack.c.bf16 %v280_v4, %v279_v3  ;;  %v515_v13 = vpack.c.bf16 %v282_v10, %v281_v9  ;;  %v283_v15 = vld [vmem:[%s901_s5 + $0x50] sm:$0xff]  ;;  %v284_v16 = vld [vmem:[%s901_s5 + $0x58] sm:$0xff]  ;;  %v285_v34 = vld [vmem:[%s901_s5 + $0x60] sm:$0xff] }
  0x1f   :  { %v519_v19 = vpack.c.bf16 %v284_v16, %v283_v15  ;;  %v303_v37 = vld [vmem:[%s901_s5 + $0xf0] sm:$0xff]  ;;  %v304_v38 = vld [vmem:[%s901_s5 + $0xf8] sm:$0xff]  ;;  %v188_v43 = vld [vmem:[%s903_s4] sm:$0x3] }
  0x20   :  { %460 = vmatpush1.bf16.msra.mxu1 %v459_v57  ;;  %v293_v57 = vld [vmem:[%s901_s5 + $0xa0] sm:$0xff]  ;;  %502 = vmatprep.subr.bf16.mxu0 %v501_v54  ;;  %v287_v40 = vld [vmem:[%s901_s5 + $0x70] sm:$0xff]  ;;  %v288_v41 = vld [vmem:[%s901_s5 + $0x78] sm:$0xff] }
  0x21   :  { %462 = vmatprep.subr.bf16.mxu1 %v461_v58  ;;  %v294_v58 = vld [vmem:[%s901_s5 + $0xa8] sm:$0xff]  ;;  %504 = vmatpush3.bf16.msra.mxu0 %v503_v59  ;;  %v389_v53 = vld [vmem:[%s904_s6] ss:$0 sm:$0xff] }
  0x22   :  { %v505_v60 = vpack.c.bf16 %v294_v58, %v293_v57 }
  0x24   :  { %464 = vmatpush1.bf16.msra.mxu1 %v463_v63  ;;  %v295_v63 = vld [vmem:[%s901_s5 + $0xb0] sm:$0xff]  ;;  %506 = vmatprep.subr.bf16.mxu0 %v505_v60 }
  0x25   :  { %466 = vmatprep.subr.bf16.mxu1 %v465_v0  ;;  %v296_v0 = vld [vmem:[%s901_s5 + $0xb8] sm:$0xff]  ;;  %508 = vmatpush3.bf16.msra.mxu0 %v507_v1 }
  0x26   :  { %v509_v2 = vpack.c.bf16 %v296_v0, %v295_v63 }
  0x28   :  { %468 = vmatpush1.bf16.msra.mxu1 %v467_v5  ;;  %v297_v5 = vld [vmem:[%s901_s5 + $0xc0] sm:$0xff]  ;;  %510 = vmatprep.subr.bf16.mxu0 %v509_v2 }
  0x29   :  { %470 = vmatprep.subr.bf16.mxu1 %v469_v6  ;;  %v298_v6 = vld [vmem:[%s901_s5 + $0xc8] sm:$0xff]  ;;  %512 = vmatpush3.bf16.msra.mxu0 %v511_v7 }
  0x2a   :  { %v513_v8 = vpack.c.bf16 %v298_v6, %v297_v5 }
  0x2c   :  { %472 = vmatpush1.bf16.msra.mxu1 %v471_v11  ;;  %v299_v11 = vld [vmem:[%s901_s5 + $0xd0] sm:$0xff]  ;;  %514 = vmatprep.subr.bf16.mxu0 %v513_v8 }
  0x2d   :  { %474 = vmatprep.subr.bf16.mxu1 %v473_v12  ;;  %v300_v12 = vld [vmem:[%s901_s5 + $0xd8] sm:$0xff]  ;;  %516 = vmatpush3.bf16.msra.mxu0 %v515_v13 }
  0x2e   :  { %v517_v14 = vpack.c.bf16 %v300_v12, %v299_v11 }
  0x30   :  { %476 = vmatpush1.bf16.msra.mxu1 %v475_v17  ;;  %v301_v17 = vld [vmem:[%s901_s5 + $0xe0] sm:$0xff]  ;;  %518 = vmatprep.subr.bf16.mxu0 %v517_v14 }
  0x31   :  { %478 = vmatprep.subr.bf16.mxu1 %v477_v18  ;;  %v302_v18 = vld [vmem:[%s901_s5 + $0xe8] sm:$0xff]  ;;  %520 = vmatpush3.bf16.msra.mxu0 %v519_v19 }
  0x32   :  { %v521_v20 = vpack.c.bf16 %v302_v18, %v301_v17 }
  0x34   :  { %480 = vmatpush1.bf16.msra.mxu1 %v479_v23  ;;  %522 = vmatprep.subr.bf16.mxu0 %v521_v20  ;;  %v39_v23 = vsub.s32 0, %v38_v22 }
  0x35   :  { %482 = vmatprep.subr.bf16.mxu1 %v481_v24  ;;  %v35_v24 = vld [vmem:[%s902_s2] sm:$0x3] }
  0x36   :  { %v40_v26 = vrot.slane %v35_v24, %v39_v23  ;;  %v44_v27 = vrot.slane %v35_v24, %v43_v25  ;;  %v193_v44 = vrot.slane %v188_v43, %v39_v23 }
  0x38   :  { %484 = vmatpush1.bf16.msra.mxu1 %v483_v29 }
  0x39   :  { %486 = vmatprep.subr.bf16.mxu1 %v485_v30 }
  0x3c   :  { %488 = vmatpush1.bf16.msra.mxu1 %v487_v35  ;;  %v286_v35 = vld [vmem:[%s901_s5 + $0x68] sm:$0xff] }
  0x3d   :  { %490 = vmatprep.subr.bf16.mxu1 %v489_v36  ;;  %v523_v36 = vpack.c.bf16 %v286_v35, %v285_v34 }
  0x3f   :  { %524 = vmatpush3.bf16.msra.mxu0 %v523_v36 }
  0x40   :  { %492 = vmatpush1.bf16.msra.mxu1 %v491_v39  ;;  %v525_v39 = vpack.c.bf16 %v304_v38, %v303_v37 }
  0x41   :  { %494 = vmatprep.subr.bf16.mxu1 %v493_v42  ;;  %v527_v42 = vpack.c.bf16 %v288_v41, %v287_v40 }
  0x42   :  { %526 = vmatprep.subr.bf16.mxu0 %v525_v39 }
  0x43   :  { %528 = vmatpush3.bf16.msra.mxu0 %v527_v42 }
  0x44   :  { %496 = vmatpush1.bf16.msra.mxu1 %v495_v45  ;;  %v197_v45 = vrot.slane %v188_v43, %v43_v25 }
  0xdf   :  { %v117_v28 = vpop.f32.mrb[0].mxu0 }
  0xe0   :  { %v118_v29 = vadd.f32 %v117_v28, %v40_v26  ;;  %v119_v30 = vpop.f32.mrb[1].mxu0 }
  0xe1   :  { %v120_v31 = vadd.f32 %v119_v30, %v44_v27 }
  0xe2   :  { %v122_v33 = vmax.f32 %v118_v29, 0.0 }
  0xe3   :  { %v123_v32 = vmax.f32 %v120_v31, 0.0 }
  0xe5   :  { %264 = vmatprep.mubr.f32.mxu1 %v123_v32 }
  0xe6   :  { %265 = vmatmul.mubr.f32.vlgmr.msra.gmra.mrb[0].mxu1 %v122_v33 }
 0x1b9   :  { %v266_v46 = vpop.f32.mrb[0].mxu1 }
 0x1ba   :  { %v267_v47 = vadd.f32 %v266_v46, %v193_v44  ;;  %v268_v48 = vpop.f32.mrb[1].mxu1 }
 0x1bb   :  { %v269_v49 = vadd.f32 %v268_v48, %v197_v45 }
 0x1bc   :  { %v271_v51 = vmax.f32 %v267_v47, 0.0 }
 0x1bd   :  { %v272_v50 = vmax.f32 %v269_v49, 0.0 }
 0x1bf   :  { %376 = vmatprep.mubr.f32.mxu0 %v272_v50 }
 0x1c0   :  { %377 = vmatmul.mubr.f32.vlgmr.msra.gmra.mrb[2].mxu0 %v271_v51 }
 0x293   :  { %v422_v52 = vpop.f32.mrb[2].mxu0 }
 0x294   :  { %v423_v54 = vpop.f32.mrb[3].mxu0 }
 0x295   :  { %v424_v55 = vadd.f32 %v423_v54, %v422_v52 }
 0x297   :  { %v379_v56 = vadd.f32 %v424_v55, %v389_v53 }
 0x299   :  { %383 = vst.msk [vmem:[%s905_s7] sm:$0xff] %vm382_vm1, %v379_v56 }

</bundles_post_ra>
